<compile_context>
chip_gen: v5e
topology: v5e:2x2
jax: 0.10.0
libtpu: 0.0.40
codegen_flags: <defaults>
</compile_context>

<pallas_src>
from functools import partial

import jax
import jax.numpy as jnp
import numpy as np
from jax.experimental import pallas as pl
from jax.experimental.pallas import tpu as pltpu

NEG_SLOPE = 0.01  # torch.nn.LeakyReLU default


def _down_kernel(se_ref, so_ref, w_ref, b_ref, o_ref, *, Ht, Wo, C):
    """Fused stride-2 3x3 conv + bias + LeakyReLU for one (batch, row-tile).

    se_ref: (1, 1, 3*C, (Ht+1)*Wo) even padded rows; the 3 column taps (kw) are
                                   stacked on the channel axis; spatially
                                   flattened with a 1-row halo for the kh=2 tap.
    so_ref: (1, 1, 3*C, Ht*Wo)     odd padded rows, same layout, no halo.
    w_ref : (C, 9*C)               weights, K axis ordered (kh, kw, ci).
    b_ref : (C, 1)                 bias.
    o_ref : (1, 1, C, Ht*Wo)       output tile, lane-dense flattened spatial.
    """
    L = Ht * Wo
    se = se_ref[...].reshape(3 * C, (Ht + 1) * Wo)
    so = so_ref[...].reshape(3 * C, L)

    # patch^T, rows ordered (kh, kw, ci) to match w_ref's K axis.
    p_t = jnp.concatenate(
        [se[:, :L],           # kh = 0 : even rows, row offset 0
         so,                  # kh = 1 : odd rows
         se[:, Wo:Wo + L]],   # kh = 2 : even rows, row offset +1 (halo row)
        axis=0)               # (9*C, Ht*Wo)

    acc = jnp.dot(w_ref[...], p_t,
                  preferred_element_type=jnp.float32,
                  precision=jax.lax.Precision.HIGHEST)         # (C, Ht*Wo)
    acc = acc + b_ref[...]                                     # (C, 1) broadcast
    out = jnp.where(acc >= 0, acc, NEG_SLOPE * acc)            # LeakyReLU
    o_ref[...] = out.reshape(o_ref.shape).astype(o_ref.dtype)


def _pick_row_tile(Ho, Wo, C, itemsize=4, budget_bytes=12 * 1024 * 1024):
    """Largest Ht dividing Ho whose double-buffered blocks fit the VMEM budget,
    keeping >= 2 row tiles when possible (pipelining / v7x megacore)."""
    def step_bytes(ht):
        n_in = 3 * C * (ht + 1) * Wo + 3 * C * ht * Wo      # se + so blocks
        n_out = C * ht * Wo
        return 2 * (n_in + n_out) * itemsize                # x2: double buffered
    ht = Ho
    while ht % 2 == 0 and (step_bytes(ht) > budget_bytes or Ho // ht < 2):
        ht //= 2
    while ht > 1 and step_bytes(ht) > budget_bytes:         # odd-Ho fallback
        ht = next(d for d in range(ht - 1, 0, -1) if Ho % d == 0)
    return ht


def downsampling_forward(x, weight, bias):
    """Conv2d(C, C, 3, stride=2, padding=1) + LeakyReLU.  NCHW in / NCHW out."""
    N, C, H, W = x.shape
    assert weight.shape == (C, C, 3, 3)
    Ho = (H - 1) // 2 + 1
    Wo = (W - 1) // 2 + 1

    Ht = _pick_row_tile(Ho, Wo, C, itemsize=x.dtype.itemsize)
    T = Ho // Ht
    Le, Lo = (Ht + 1) * Wo, Ht * Wo

    # ---- wrapper-side rearrangement (XLA fuses pad + strided slices + stack;
    #      the padded image is never materialized on its own in HBM). --------
    xp = jnp.pad(x, ((0, 0), (0, 0),
                     (1, max(0, 2 * Ho - H)),
                     (1, max(0, 2 * Wo - W))))
    re = xp[:, :, 0:2 * Ho + 1:2, :]       # even padded rows: (N, C, Ho+1, Wp)
    ro = xp[:, :, 1:2 * Ho:2, :]           # odd  padded rows: (N, C, Ho,   Wp)
    col = (slice(0, 2 * Wo - 1, 2),        # kw = 0 taps
           slice(1, 2 * Wo, 2),            # kw = 1 taps
           slice(2, 2 * Wo + 1, 2))        # kw = 2 taps
    re3 = jnp.concatenate([re[:, :, :, c] for c in col], axis=1)  # (N,3C,Ho+1,Wo)
    ro3 = jnp.concatenate([ro[:, :, :, c] for c in col], axis=1)  # (N,3C,Ho,  Wo)

    # Row tiles; the even-row source carries a 1-row halo for the kh=2 tap.
    se = jnp.stack([re3[:, :, t * Ht:t * Ht + Ht + 1, :] for t in range(T)],
                   axis=1).reshape(N, T, 3 * C, Le)
    so = jnp.stack([ro3[:, :, t * Ht:(t + 1) * Ht, :] for t in range(T)],
                   axis=1).reshape(N, T, 3 * C, Lo)

    # Weights: (O, I, kh, kw) -> (O, kh, kw, I) -> (C, 9*C); K axis = (kh, kw, ci).
    wm = jnp.transpose(weight, (0, 2, 3, 1)).reshape(C, 9 * C)
    b2 = bias.reshape(C, 1)

    kernel = partial(_down_kernel, Ht=Ht, Wo=Wo, C=C)
    out = pl.pallas_call(
        kernel,
        out_shape=jax.ShapeDtypeStruct((N, T, C, Lo), x.dtype),
        grid=(N, T),
        in_specs=[
            pl.BlockSpec((1, 1, 3 * C, Le), lambda n, t: (n, t, 0, 0)),
            pl.BlockSpec((1, 1, 3 * C, Lo), lambda n, t: (n, t, 0, 0)),
            pl.BlockSpec((C, 9 * C), lambda n, t: (0, 0)),
            pl.BlockSpec((C, 1), lambda n, t: (0, 0)),
        ],
        out_specs=pl.BlockSpec((1, 1, C, Lo), lambda n, t: (n, t, 0, 0)),
        compiler_params=pltpu.CompilerParams(
            dimension_semantics=("parallel", "parallel"),
            vmem_limit_bytes=32 * 1024 * 1024),
    )(se, so, wm, b2)

    # Un-flatten the lane-dense output back to NCHW (the output is 4x smaller
    # than the input, so this is cheap compared with the removed input-side
    # NCHW<->NHWC transposes of the previous version).
    return (out.reshape(N, T, C, Ht, Wo)
               .transpose(0, 2, 1, 3, 4)
               .reshape(N, C, Ho, Wo))


if __name__ == "__main__":
    key = jax.random.PRNGKey(0)
    kx, kw, kb = jax.random.split(key, 3)

    # Small shapes consistent with the module: N=2, C=4, H=W=16 (NCHW).
    N, C, H, W = 2, 4, 16, 16
    x = jax.random.normal(kx, (N, C, H, W), jnp.float32)

    # Deterministic parameter init (same shapes as nn.Conv2d(C, C, 3, 2, 1)).
    fan_in = C * 3 * 3
    bound = 1.0 / np.sqrt(fan_in)
    weight = jax.random.uniform(kw, (C, C, 3, 3), jnp.float32, -bound, bound)
    bias = jax.random.uniform(kb, (C,), jnp.float32, -bound, bound)

    y = jax.block_until_ready(downsampling_forward(x, weight, bias))
    assert y.shape == (N, C, H // 2, W // 2)

    # Reference check against XLA's conv + LeakyReLU.
    ref = jax.lax.conv_general_dilated(
        x, weight, window_strides=(2, 2), padding=((1, 1), (1, 1)),
        dimension_numbers=("NCHW", "OIHW", "NCHW"),
        precision=jax.lax.Precision.HIGHEST)
    ref = ref + bias.reshape(1, C, 1, 1)
    ref = jnp.where(ref >= 0, ref, NEG_SLOPE * ref)
    np.testing.assert_allclose(np.asarray(y), np.asarray(ref),
                               rtol=1e-3, atol=1e-3)

    print("KERNEL_OK")
</pallas_src>

<mosaic_0001>
module attributes {stable_mosaic.version = 11 : i64} {
  func.func @_down_kernel(%arg0: i32, %arg1: i32, %arg2: memref<1x1x12x40xf32, #tpu.memory_space<vmem>>, %arg3: memref<1x1x12x32xf32, #tpu.memory_space<vmem>>, %arg4: memref<4x36xf32, #tpu.memory_space<vmem>>, %arg5: memref<4x1xf32, #tpu.memory_space<vmem>>, %arg6: memref<1x1x4x32xf32, #tpu.memory_space<vmem>>) attributes {dimension_semantics = [#tpu.dimension_semantics<parallel>, #tpu.dimension_semantics<parallel>], iteration_bounds = array<i64: 2, 2>, scalar_prefetch = 0 : i64, scratch_operands = 0 : i64, tpu.core_type = #tpu.core_type<tc>, window_params = [{transform_indices = @transform_0, window_bounds = array<i64: 1, 1, 12, 40>}, {transform_indices = @transform_1, window_bounds = array<i64: 1, 1, 12, 32>}, {pipeline_mode = #tpu.pipeline_mode<synchronous>, transform_indices = @transform_2, window_bounds = array<i64: 4, 36>}, {pipeline_mode = #tpu.pipeline_mode<synchronous>, transform_indices = @transform_3, window_bounds = array<i64: 4, 1>}, {transform_indices = @transform_4, window_bounds = array<i64: 1, 1, 4, 32>}]} {
    %c0 = arith.constant 0 : index
    %c0_0 = arith.constant 0 : index
    %c0_1 = arith.constant 0 : index
    %c0_2 = arith.constant 0 : index
    %0 = vector.load %arg2[%c0, %c0_0, %c0_1, %c0_2] : memref<1x1x12x40xf32, #tpu.memory_space<vmem>>, vector<1x1x12x40xf32>
    %1 = vector.shape_cast %0 : vector<1x1x12x40xf32> to vector<12x40xf32>
    %c0_3 = arith.constant 0 : index
    %c0_4 = arith.constant 0 : index
    %c0_5 = arith.constant 0 : index
    %c0_6 = arith.constant 0 : index
    %2 = vector.load %arg3[%c0_3, %c0_4, %c0_5, %c0_6] : memref<1x1x12x32xf32, #tpu.memory_space<vmem>>, vector<1x1x12x32xf32>
    %3 = vector.shape_cast %2 : vector<1x1x12x32xf32> to vector<12x32xf32>
    %4 = vector.extract_strided_slice %1 {offsets = [0, 0], sizes = [12, 32], strides = [1, 1]} : vector<12x40xf32> to vector<12x32xf32>
    %5 = vector.extract_strided_slice %1 {offsets = [0, 8], sizes = [12, 32], strides = [1, 1]} : vector<12x40xf32> to vector<12x32xf32>
    %6 = tpu.concatenate %4, %3, %5 in 0 : vector<12x32xf32>, vector<12x32xf32>, vector<12x32xf32> -> vector<36x32xf32>
    %c0_7 = arith.constant 0 : index
    %c0_8 = arith.constant 0 : index
    %7 = vector.load %arg4[%c0_7, %c0_8] : memref<4x36xf32, #tpu.memory_space<vmem>>, vector<4x36xf32>
    %cst = arith.constant dense<0.000000e+00> : vector<4x32xf32>
    %8 = tpu.matmul %7, %6, %cst {dimension_numbers = #tpu.dot_dimension_numbers<[1], [0], [0], [1], [0, 0, 1, 1], [], []>, precision = #tpu.contract_precision<fp32>} : vector<4x36xf32>, vector<36x32xf32>, vector<4x32xf32> -> vector<4x32xf32>
    %c0_9 = arith.constant 0 : index
    %c0_10 = arith.constant 0 : index
    %9 = vector.load %arg5[%c0_9, %c0_10] : memref<4x1xf32, #tpu.memory_space<vmem>>, vector<4x1xf32>
    %10 = vector.broadcast %9 : vector<4x1xf32> to vector<4x32xf32>
    %11 = arith.addf %8, %10 : vector<4x32xf32>
    %cst_11 = arith.constant 0.000000e+00 : f32
    %12 = vector.broadcast %cst_11 : f32 to vector<4x32xf32>
    %13 = arith.cmpf oge, %11, %12 : vector<4x32xf32>
    %cst_12 = arith.constant 0.00999999977 : f32
    %14 = vector.broadcast %cst_12 : f32 to vector<4x32xf32>
    %15 = arith.mulf %14, %11 : vector<4x32xf32>
    %16 = arith.select %13, %11, %15 : vector<4x32xi1>, vector<4x32xf32>
    %17 = vector.shape_cast %16 : vector<4x32xf32> to vector<1x1x4x32xf32>
    %c0_13 = arith.constant 0 : index
    %c0_14 = arith.constant 0 : index
    %c0_15 = arith.constant 0 : index
    %c0_16 = arith.constant 0 : index
    %18 = vector.load %arg6[%c0_13, %c0_14, %c0_15, %c0_16] : memref<1x1x4x32xf32, #tpu.memory_space<vmem>>, vector<1x1x4x32xf32>
    tpu.vector_store %arg6[%c0_13, %c0_14, %c0_15, %c0_16], %17 {strides = array<i32>} : memref<1x1x4x32xf32, #tpu.memory_space<vmem>>, vector<1x1x4x32xf32>,
    return
  }
  func.func @transform_0(%arg0: i32, %arg1: i32) -> (i32, i32, i32, i32) {
    %c0_i32 = arith.constant 0 : i32
    %c0_i32_0 = arith.constant 0 : i32
    %c0_i32_1 = arith.constant 0 : i32
    return %arg0, %arg1, %c0_i32, %c0_i32_0 : i32, i32, i32, i32
  }
  func.func @transform_1(%arg0: i32, %arg1: i32) -> (i32, i32, i32, i32) {
    %c0_i32 = arith.constant 0 : i32
    %c0_i32_0 = arith.constant 0 : i32
    %c0_i32_1 = arith.constant 0 : i32
    return %arg0, %arg1, %c0_i32, %c0_i32_0 : i32, i32, i32, i32
  }
  func.func @transform_2(%arg0: i32, %arg1: i32) -> (i32, i32) {
    %c0_i32 = arith.constant 0 : i32
    %c0_i32_0 = arith.constant 0 : i32
    %c0_i32_1 = arith.constant 0 : i32
    return %c0_i32, %c0_i32_0 : i32, i32
  }
  func.func @transform_3(%arg0: i32, %arg1: i32) -> (i32, i32) {
    %c0_i32 = arith.constant 0 : i32
    %c0_i32_0 = arith.constant 0 : i32
    %c0_i32_1 = arith.constant 0 : i32
    return %c0_i32, %c0_i32_0 : i32, i32
  }
  func.func @transform_4(%arg0: i32, %arg1: i32) -> (i32, i32, i32, i32) {
    %c0_i32 = arith.constant 0 : i32
    %c0_i32_0 = arith.constant 0 : i32
    %c0_i32_1 = arith.constant 0 : i32
    return %arg0, %arg1, %c0_i32, %c0_i32_0 : i32, i32, i32, i32
  }
}

</mosaic_0001>

<bundles_post_ra>
// kernel: tpu_custom_call.1
= control target key start
LH: loop header
LB: loop body
LE: loop exit
PB: predicated region body
PF: predicated region fallthrough
CT: control target
= control target key end

     0   :  { %9 = vsyncpa [#allocation3], 0  ;;  %s978_s0 = inlined_call_operand.vmem [shape: f32[2,2,12,40], index: 0, kind: input, shape index: {}]   ;;  %s979_s1 = inlined_call_operand.vmem [shape: f32[2,2,12,32], index: 1, kind: input, shape index: {}]   ;;  %s980_s2 = inlined_call_operand.vmem [shape: f32[4,36], index: 2, kind: input, shape index: {}]   ;;  %s981_s3 = inlined_call_operand.vmem [shape: f32[4,1], index: 3, kind: input, shape index: {}]   ;;  %s982_s4 = inlined_call_operand.hbm [shape: f32[2,2,4,32], index: 4, kind: output, shape index: {}]  }
   0x1   :  { %11 = vsyncpa [#allocation3 + $0x1], 0  ;;  %s829_s15 = smov 0   ;;  %s831_s16 = smov 0  }
   0x2   :  { %s833_s17 = smov 0   ;;  %s835_s18 = smov 0  }
   0x3   :  { %s837_s19 = smov 0   ;;  %s839_s20 = smov 0  }
   0x4   :  { %s841_s21 = smov 0   ;;  %s843_s22 = smov 0  }
   0x5 LB: > { %s614_s23 = sadd.s32 4294967295, %s800_s22   ;;  %s615_s24 = sadd.s32 4294967294, %s800_s22   ;;  %s800_s22 = sphi %s843_s22, %s17_s22   ;;  %s796_s21 = sphi %s841_s21, %s991_s21   ;;  %s792_s20 = sphi %s839_s20, %s990_s20   ;;  %s788_s19 = sphi %s837_s19, %s989_s19   ;;  %s784_s18 = sphi %s835_s18, %s988_s18   ;;  %s780_s17 = sphi %s833_s17, %s987_s17   ;;  %s776_s16 = sphi %s831_s16, %s986_s16   ;;  %s772_s15 = sphi %s829_s15, %s985_s15  }
   0x6   : > { %s26_s25 = sadd.s32 1, %s792_s20  ;;  %s29_s26 = sadd.s32 1, %s796_s21 }
   0x7   : > { %p27_p0 = scmp.ge.s32.totalorder %s26_s25, 2  ;;  %p146_p1 = scmp.ne.s32.totalorder %s780_s17, %s776_s16 }
   0x8   : > { %p147_p2 = scmp.eq.s32.totalorder %s614_s23, 3  ;;  %p152_p5 = scmp.ne.s32.totalorder %s776_s16, %s772_s15 }
   0x9   : > { %s993_s25 = smov (%p27_p0, %s26_s25), 0  ;;  %s995_s26 = smov (!%p27_p0, %s29_s26), %s796_s21 }
   0xa   : > { %s132_s27 = ssub.s32 %s792_s20, %s993_s25  ;;  %p880_p3 = por %p147_p2, %p146_p1 }
   0xb   : > { %p31_p4 = scmp.ge.s32.totalorder %s995_s26, 2  ;;  %p153_p6 = scmp.eq.s32.totalorder %s615_s24, 3 }
   0xc   : > { %p618_p7 = scmp.ge.s32.totalorder %s800_s22, 1  ;;  %p201_p9 = scmp.lt.s32.totalorder %s800_s22, 5 }
   0xd   : > { %s997_s26 = smov (%p31_p4, %s995_s26), 0  ;;  %p889_p8 = por %p153_p6, %p152_p5 }
   0xe   : > { %s131_s30 = ssub.s32 %s796_s21, %s997_s26  ;;  %s136_s5 = sadd.s32 1, %s780_s17 }
   0xf   : > { %s133_s6 = sor.u32 %s132_s27, %s131_s30  ;;  %p202_p10 = pnand %p618_p7, %p201_p9 }
  0x10   : > { %p134_p11 = scmp.eq.s32.totalorder %s133_s6, 0  ;;  %p240_p12 = scmp.lt.s32.totalorder (!%p202_p10), %s788_s19, 1 }
  0x11   : > { %205 = sbr.rel (%p202_p10) target bundleno = 315 (0x13b), region = 36  ;;  %p242_p13 = scmp.lt.s32.totalorder (!%p202_p10), %s784_s18, 1 }
  0x12   : > { %s898_s7 = scalar_select %p134_p11, %s780_s17, %s136_s5  }
  0x13   : > { %s802_s6 = smov (!%p202_p10), 120  }
  0x16   : > { %s241_s8 = scalar_select %p240_p12, %s788_s19, 1  ;;  %vm264_vm0 = vcmask 1043456   ;;  %v278_v7 = vld [vmem:[%s980_s2] sm:$0xf]  ;;  %vm285_vm1 = vcmask 293888   ;;  %v803_v16 = vmov 0  }
  0x17   : > { %s243_s9 = scalar_select %p242_p13, %s784_s18, 1  ;;  %v287_v9 = vsel %vm285_vm1, %v278_v7, 0  ;;  %704 = vset.pattern.permute.xlu1 %v803_v16  ;;  %v279_v17 = vld [vmem:[%s981_s3] sm:$0xf]  ;;  %705 = vset.pattern.permute.xlu0 %v803_v16  ;;  %vm492_vm3 = vcmask 257024  }
  0x18   : > { %s621_s10 = sshll.u32 %s241_s8, 2  ;;  %v915_v13 = vand.u32 4294901760, %v287_v9  ;;  %282 = vperm.xlu1 %704, %v279_v17  }
  0x19   : > { %s620_s11 = sshll.u32 %s243_s9, 1 }
  0x1a   : > { %s246_s12 = sadd.s32 %s621_s10, %s620_s11  ;;  %v313_v21 = vsub.f32 %v287_v9, %v915_v13 }
  0x1b   : > { %s622_s13 = sshll.u32 %s246_s12, 3  ;;  %s627_s12 = sshll.u32 %s788_s19, 1 }
  0x1c   : > { %s248_s24 = scalar_lea.vmem %s978_s0, %s622_s13  ;;  %s257_s5 = scalar_lea.vmem %s979_s1, %s622_s13  ;;  %v314_v29 = vand.u32 4294901760, %v313_v21 }
  0x1d   : > { %v259_v0 = vld [vmem:[%s248_s24 + $0x8] sm:$0xf]  ;;  %v260_v1 = vld [vmem:[%s257_s5] sm:$0xff]  ;;  %s237_s13 = sand.u32 1, %s776_s16   ;;  %s505_s14 = sadd.s32 %s784_s18, %s627_s12 }
  0x1e   : > { %v265_v2 = vrot.slane %v260_v1, 4  ;;  %274 = vrot.lane.b32.xlu0 %v259_v0, %s802_s6  ;;  %v258_v4 = vld [vmem:[%s248_s24] sm:$0xff]  ;;  %v261_v5 = vld [vmem:[%s257_s5 + $0x8] sm:$0xf]  ;;  %v315_v35 = vsub.f32 %v313_v21, %v314_v29  ;;  %s619_s23 = sshll.u32 %s237_s13, 2  ;;  %s628_s24 = sshll.u32 %s505_s14, 2 }
  0x1f   : > { %v266_v6 = vrot.slane %v261_v5, 4  ;;  %v310_v19 = vand.u32 4294901760, %v258_v4  ;;  %s507_s5 = scalar_lea.hbm %s982_s4, %s628_s24  ;;  %s239_s19 = scalar_lea.vmem [#allocation2], %s619_s23 }
  0x20   : > { %v277_v3 = vsel %vm264_vm0, %v259_v0, %v265_v2  ;;  %v316_v41 = vand.u32 4294901760, %v315_v35  ;;  %s511_s8 = sshll.u32 %s507_s5, 4  ;;  %s495_s18 = scalar_lea.sflag [#allocation3], %s237_s13  ;;  %s512_s8 = int_to_ptr.hbm [resolvable:$true] %s511_s8 }
  0x21   : > { %v267_v8 = vsel %vm264_vm0, %v265_v2, %v266_v6  ;;  %v917_v15 = vand.u32 4294901760, %v277_v3  ;;  %v357_v28 = vsub.f32 %v258_v4, %v310_v19  ;;  %s720_s9 = sshra.s32 %s512_s8, 4  ;;  %s726_s14 = scalar_lea.hbm %s982_s4, 16  ;;  %s721_s9 = int_to_ptr.hbm [resolvable:$true] %s720_s9 }
  0x22   : > { %v913_v12 = vand.u32 4294901760, %v267_v8  ;;  %s722_s10 = scalar_lea.hbm %s721_s9, 4  ;;  %p727_p4 = scmp.lt.s32.totalorder %s721_s9, %s982_s4 }
  0x23   : > { %v351_v23 = vsub.f32 %v277_v3, %v917_v15  ;;  %v358_v36 = vand.u32 4294901760, %v357_v28  ;;  %p723_p0 = scmp.ne.s32.totalorder %s721_s9, %s722_s10  ;;  %p728_p5 = scmp.lt.s32.totalorder %s726_s14, %s722_s10 }
  0x24   : > { %v345_v20 = vsub.f32 %v267_v8, %v913_v12 }
  0x25   : > { %v352_v32 = vand.u32 4294901760, %v351_v23  ;;  %v359_v42 = vsub.f32 %v357_v28, %v358_v36  ;;  %p724_p1 = pnand %p723_p0, %p880_p3  ;;  %p729_p6 = por %p728_p5, %p727_p4 }
  0x26   : > { %272 = vrot.lane.b32.xlu0 %v258_v4, %s802_s6  ;;  %v346_v27 = vand.u32 4294901760, %v345_v20  ;;  %s509_s6 = sshll.u32 %s239_s19, 4  ;;  %s510_s6 = int_to_ptr.vmem [resolvable:$true] %s509_s6 }
  0x27   : > { %v353_v38 = vsub.f32 %v351_v23, %v352_v32  ;;  %v360_v44 = vand.u32 4294901760, %v359_v42  ;;  %p725_p2 = pneg %p724_p1 }
  0x28   : > { %v347_v34 = vsub.f32 %v345_v20, %v346_v27 }
  0x29   : > { %v354_v43 = vand.u32 4294901760, %v353_v38  ;;  %p730_p7 = pnand %p729_p6, %p725_p2 }
  0x2a   : > { %v348_v40 = vand.u32 4294901760, %v347_v34 }
  0x8a   : > { %v283_v45 = vpop.permute.xlu1 %282 }
  0x90   : > { %v275_v10 = vpop.permute.xlu0 %274 }
  0x91   : > { %v289_v11 = vsel %vm264_vm0, %v275_v10, 0 }
  0x92   : > { %v302_v14 = vand.u32 4294901760, %v289_v11 }
  0x94   : > { %v333_v18 = vsub.f32 %v289_v11, %v302_v14  ;;  %303 = vmatpush.msra.mxu0 %v302_v14  ;;  %411 = vmatpush.msra.mxu3 %v302_v14 }
  0x96   : > { %380 = vmatpush.msra.mxu2 %v333_v18  ;;  %v334_v22 = vand.u32 4294901760, %v333_v18 }
  0x98   : > { %v273_v24 = vpop.permute.xlu0 %272  ;;  %v335_v25 = vsub.f32 %v333_v18, %v334_v22 }
  0x99   : > { %v304_v26 = vand.u32 4294901760, %v273_v24 }
  0x9a   : > { %v336_v30 = vand.u32 4294901760, %v335_v25 }
  0x9b   : > { %v339_v31 = vsub.f32 %v273_v24, %v304_v26  ;;  %305 = vmatpush.msra.mxu0 %v304_v26  ;;  %413 = vmatpush.msra.mxu3 %v304_v26 }
  0x9c   : > { %337 = vmatpush.msra.mxu1 %v336_v30 }
  0x9d   : > { %307 = vmatpush.msra.mxu0 %v913_v12  ;;  %383 = vmatpush.msra.mxu2 %v339_v31  ;;  %v340_v33 = vand.u32 4294901760, %v339_v31 }
  0x9e   : > { %415 = vmatpush.msra.mxu3 %v913_v12 }
  0x9f   : > { %309 = vmatpush.msra.mxu0 %v917_v15  ;;  %386 = vmatpush.msra.mxu2 %v345_v20  ;;  %v341_v37 = vsub.f32 %v339_v31, %v340_v33 }
  0xa0   : > { %417 = vmatpush.msra.mxu3 %v917_v15 }
  0xa1   : > { %311 = vmatpush.msra.mxu0 %v310_v19  ;;  %v342_v39 = vand.u32 4294901760, %v341_v37  ;;  %389 = vmatpush.msra.mxu2 %v351_v23 }
  0xa2   : > { %419 = vmatpush.msra.mxu3 %v310_v19  ;;  %317 = vmatmul.f32.vlgmr.msra.gmra.mxu0 %v316_v41 }
  0xa3   : > { %441 = vmatpush.msrb.mxu0 %v334_v22  ;;  %343 = vmatpush.msra.mxu1 %v342_v39 }
  0xa4   : > { %392 = vmatpush.msra.mxu2 %v357_v28  ;;  %423 = vmatmul.f32.vlgmr.msra.gmra.mxu3 %v314_v29 }
  0xa5   : > { %445 = vmatpush.msrb.mxu0 %v340_v33  ;;  %395 = vmatmul.f32.vlgmr.msra.gmra.mxu2 %v313_v21 }
  0xa6   : > { %349 = vmatpush.msra.mxu1 %v348_v40 }
  0xa7   : > { %449 = vmatpush.msrb.mxu0 %v346_v27 }
  0xa8   : > { %355 = vmatpush.msra.mxu1 %v354_v43 }
  0xa9   : > { %453 = vmatpush.msrb.mxu0 %v352_v32 }
  0xaa   : > { %361 = vmatpush.msra.mxu1 %v360_v44 }
  0xab   : > { %457 = vmatpush.msrb.mxu0 %v358_v36  ;;  %363 = vmatmul.f32.vlgmr.msra.gmra.mxu1 %v915_v13 }
  0xac   : > { %475 = vmatpush.msrb.mxu1 %v302_v14  ;;  %459 = vmatmul.f32.vlgmr.msrb.gmra.mxu0 %v915_v13 }
  0xae   : > { %477 = vmatpush.msrb.mxu1 %v304_v26 }
  0xb0   : > { %479 = vmatpush.msrb.mxu1 %v913_v12 }
  0xb2   : > { %481 = vmatpush.msrb.mxu1 %v917_v15 }
  0xb4   : > { %483 = vmatpush.msrb.mxu1 %v310_v19 }
  0xb5   : > { %485 = vmatmul.f32.vlgmr.msrb.gmra.mxu1 %v915_v13 }
 0x11f   : > { %v318_v46 = vpop.f32.mrf.mxu0 }
 0x120   : > { %v319_v47 = vadd.f32 %v318_v46, %v283_v45 }
 0x127   : > { %v424_v51 = vpop.f32.mrf.mxu3 }
 0x128   : > { %v364_v48 = vpop.f32.mrf.mxu1  ;;  %v396_v49 = vpop.f32.mrf.mxu2 }
 0x129   : > { %v365_v50 = vadd.f32 %v364_v48, %v319_v47  ;;  %v460_v53 = vpop.f32.mrf.mxu0 }
 0x12b   : > { %v397_v52 = vadd.f32 %v396_v49, %v365_v50 }
 0x12d   : > { %v425_v54 = vadd.f32 %v424_v51, %v397_v52 }
 0x12f   : > { %v461_v55 = vadd.f32 %v460_v53, %v425_v54 }
 0x132   : > { %v486_v56 = vpop.f32.mrf.mxu1 }
 0x133   : > { %v487_v57 = vadd.f32 %v486_v56, %v461_v55 }
 0x135   : > { %vm489_vm2 = vcmp.ge.f32.partialorder %v487_v57, 0.0  ;;  %v490_v58 = vmul.f32 0.01, %v487_v57 }
 0x137   : > { %v491_v59 = vsel %vm489_vm2, %v487_v57, %v490_v58 }
 0x138   : > { %493 = vst.msk [vmem:[%s239_s19] sm:$0xf] %vm492_vm3, %v491_v59 }
 0x139   : > { %733 = shalt.err (!%p730_p7)
}
 0x13a   : > { %631 = dma.vmem_to_hbm [thread:$0]  (%p880_p3), %s510_s6, 64, %s512_s8, %s495_s18  }
 0x13b PF: > { %p637_p9 = scmp.ge.s32.totalorder %s800_s22, 2  ;;  %s523_s13 = sand.u32 1, %s772_s15  }
 0x13c   : > { %s524_s27 = scalar_lea.sflag [#allocation3], %s523_s13 }
 0x13d   : > { %p634_p10 = pnand %p637_p9, %p889_p8 }
 0x13f   : > { %p635_p11 = pneg %p634_p10 }
 0x141   : > { %767 = dma.done.wait (%p635_p11), %s524_s27, 64  }
 0x142   : > { %769 = vsyncadd (%p635_p11), %s524_s27, 4294967232  ;;  %s17_s22 = sadd.s32 1, %s800_s22   ;;  %s985_s15 = smov %s776_s16 }
 0x143   : > { %p14_p12 = scmp.ge.s32.totalorder %s17_s22, 6   ;;  %s986_s16 = smov %s780_s17 }
 0x144   : > { %s987_s17 = smov %s898_s7  ;;  %s988_s18 = smov %s792_s20 }
 0x145   : > { %s989_s19 = smov %s796_s21  ;;  %s990_s20 = smov %s993_s25 }
 0x146   : > { %s991_s21 = smov %s997_s26  ;;  %16 = sbr.rel (!%p14_p12) target bundleno = 5 (0x5), region = 74 }
 0x14b   :  { %530 = vsyncpa [#allocation3], 1 }
 0x14c   :  { %532 = vsyncpa [#allocation3 + $0x1], 1 }

</bundles_post_ra>
